<compile_context>
chip_gen: v5e
topology: v5e:2x2
jax: 0.10.0
libtpu: 0.0.40
codegen_flags: <defaults>
</compile_context>

<pallas_src>
import jax
import jax.numpy as jnp
from jax.experimental import pallas as pl
from jax.experimental.pallas import tpu as pltpu

NEG_SLOPE = 0.01  # F.leaky_relu default negative_slope
H1, H2 = 256, 512


def _leaky_relu(x):
    return jnp.where(x > 0, x, NEG_SLOPE * x)


def _round_up(n, m):
    return ((n + m - 1) // m) * m


def generator_kernel(x_ref, w1_ref, b1_ref, w2_ref, b2_ref, w3_ref, b3_ref, o_ref):
    # Layer 1: [TM, N] @ [N, 256]  (f32 accumulate on MXU), bias + leaky in f32.
    h = jnp.dot(x_ref[...], w1_ref[...], preferred_element_type=jnp.float32)
    h = _leaky_relu(h + b1_ref[...])
    # Layer 2: [TM, 256] @ [256, 512]
    h = jnp.dot(h.astype(w2_ref.dtype), w2_ref[...], preferred_element_type=jnp.float32)
    h = _leaky_relu(h + b2_ref[...])
    # Layer 3: [TM, 512] @ [512, F_pad]   (F_pad is a multiple of 128 -> lane-dense store)
    h = jnp.dot(h.astype(w3_ref.dtype), w3_ref[...], preferred_element_type=jnp.float32)
    h = _leaky_relu(h + b3_ref[...])
    o_ref[...] = h.astype(o_ref.dtype)


def prepare_params(params, *, weight_dtype=jnp.float32):
    """One-time prep: transpose weights to [in, out], pad fc3 out-dim to a
    multiple of 128 (lane-dense output), reshape biases to [1, out] rows.
    Biases stay f32 regardless of weight dtype (bias add / leaky in f32)."""
    features = params["fc3_w"].shape[0]
    f_pad = _round_up(features, 128)

    w3 = params["fc3_w"].T  # [512, F]
    b3 = params["fc3_b"]
    if f_pad != features:
        w3 = jnp.pad(w3, ((0, 0), (0, f_pad - features)))
        b3 = jnp.pad(b3, (0, f_pad - features))

    return {
        "w1": params["fc1_w"].T.astype(weight_dtype),
        "b1": params["fc1_b"].reshape(1, -1).astype(jnp.float32),
        "w2": params["fc2_w"].T.astype(weight_dtype),
        "b2": params["fc2_b"].reshape(1, -1).astype(jnp.float32),
        "w3": w3.astype(weight_dtype),
        "b3": b3.reshape(1, -1).astype(jnp.float32),
        "features": features,
    }


def generator_forward(x, prep, *, tm=None):
    """x: [B, noise_size]. prep: output of prepare_params(). Returns [B, features] f32."""
    B, N = x.shape
    w1, b1 = prep["w1"], prep["b1"]
    w2, b2 = prep["w2"], prep["b2"]
    w3, b3 = prep["w3"], prep["b3"]
    features = prep["features"]
    f_pad = w3.shape[1]

    # Batch tile: multiple of 8 (sublane), capped at 256 (fills MXU rows on
    # v6e/v7x, 2x128 rows on v5e) -- small demo batches still run with grid=1.
    if tm is None:
        tm = max(8, min(256, _round_up(B, 8)))
    b_pad = _round_up(B, tm)

    x_in = x if b_pad == B else jnp.pad(x, ((0, b_pad - B), (0, 0)))
    x_in = x_in.astype(w1.dtype)

    grid = (b_pad // tm,)
    resident = lambda shape: pl.BlockSpec(shape, lambda i: (0, 0))  # stays in VMEM

    flops = 2 * b_pad * (N * H1 + H1 * H2 + H2 * f_pad)
    bytes_accessed = (
        x_in.size * x_in.dtype.itemsize
        + sum(a.size * a.dtype.itemsize for a in (w1, b1, w2, b2, w3, b3))
        + b_pad * f_pad * 4
    )

    out = pl.pallas_call(
        generator_kernel,
        out_shape=jax.ShapeDtypeStruct((b_pad, f_pad), jnp.float32),
        grid_spec=pltpu.PrefetchScalarGridSpec(
            num_scalar_prefetch=0,
            grid=grid,
            in_specs=[
                pl.BlockSpec((tm, N), lambda i: (i, 0)),   # batch-tiled noise
                resident(w1.shape), resident(b1.shape),
                resident(w2.shape), resident(b2.shape),
                resident(w3.shape), resident(b3.shape),
            ],
            out_specs=pl.BlockSpec((tm, f_pad), lambda i: (i, 0)),
        ),
        compiler_params=pltpu.CompilerParams(
            dimension_semantics=("parallel",),  # megacore sharding on v7x
        ),
        cost_estimate=pl.CostEstimate(
            flops=flops, transcendentals=0, bytes_accessed=bytes_accessed),
    )(x_in, w1, b1, w2, b2, w3, b3)

    return out[:B, :features]


def init_params(key, noise_size, features):
    """Deterministic init matching nn.Linear shapes (weight: [out, in])."""
    ks = jax.random.split(key, 6)

    def uinit(k, shape, fan_in):
        bound = 1.0 / jnp.sqrt(fan_in)
        return jax.random.uniform(k, shape, jnp.float32, -bound, bound)

    return {
        "fc1_w": uinit(ks[0], (H1, noise_size), noise_size),
        "fc1_b": uinit(ks[1], (H1,), noise_size),
        "fc2_w": uinit(ks[2], (H2, H1), H1),
        "fc2_b": uinit(ks[3], (H2,), H1),
        "fc3_w": uinit(ks[4], (features, H2), H2),
        "fc3_b": uinit(ks[5], (features,), H2),
    }


def reference_forward(x, params):
    def lrelu(v):
        return jnp.where(v > 0, v, NEG_SLOPE * v)

    h = lrelu(x @ params["fc1_w"].T + params["fc1_b"])
    h = lrelu(h @ params["fc2_w"].T + params["fc2_b"])
    return lrelu(h @ params["fc3_w"].T + params["fc3_b"])


if __name__ == "__main__":
    noise_size = 32
    features = 64
    batch = 8

    key = jax.random.PRNGKey(0)
    k_x, k_p = jax.random.split(key)
    x = jax.random.normal(k_x, (batch, noise_size), jnp.float32)
    params = init_params(k_p, noise_size, features)

    # f32 path (exact check vs. pure-JAX reference)
    prep_f32 = prepare_params(params, weight_dtype=jnp.float32)
    out = jax.block_until_ready(generator_forward(x, prep_f32))
    ref = reference_forward(x, params)
    assert out.shape == (batch, features), out.shape
    assert jnp.allclose(out, ref, atol=1e-5, rtol=1e-5), "mismatch vs JAX reference"

    # bf16 weights/activations path (v6e/v7x bandwidth option) -- smoke test.
    prep_bf16 = prepare_params(params, weight_dtype=jnp.bfloat16)
    out_bf16 = jax.block_until_ready(generator_forward(x, prep_bf16))
    assert out_bf16.shape == (batch, features)
    assert bool(jnp.all(jnp.isfinite(out_bf16)))

    print("KERNEL_OK")
</pallas_src>

<mosaic_0001>
module attributes {stable_mosaic.version = 11 : i64} {
  func.func @generator_kernel(%arg0: i32, %arg1: memref<8x32xf32, #tpu.memory_space<vmem>>, %arg2: memref<32x256xf32, #tpu.memory_space<vmem>>, %arg3: memref<1x256xf32, #tpu.memory_space<vmem>>, %arg4: memref<256x512xf32, #tpu.memory_space<vmem>>, %arg5: memref<1x512xf32, #tpu.memory_space<vmem>>, %arg6: memref<512x128xf32, #tpu.memory_space<vmem>>, %arg7: memref<1x128xf32, #tpu.memory_space<vmem>>, %arg8: memref<8x128xf32, #tpu.memory_space<vmem>>) attributes {dimension_semantics = [#tpu.dimension_semantics<parallel>], iteration_bounds = array<i64: 1>, scalar_prefetch = 0 : i64, scratch_operands = 0 : i64, tpu.core_type = #tpu.core_type<tc>, window_params = [{transform_indices = @transform_0, window_bounds = array<i64: 8, 32>}, {pipeline_mode = #tpu.pipeline_mode<synchronous>, transform_indices = @transform_1, window_bounds = array<i64: 32, 256>}, {pipeline_mode = #tpu.pipeline_mode<synchronous>, transform_indices = @transform_2, window_bounds = array<i64: 1, 256>}, {pipeline_mode = #tpu.pipeline_mode<synchronous>, transform_indices = @transform_3, window_bounds = array<i64: 256, 512>}, {pipeline_mode = #tpu.pipeline_mode<synchronous>, transform_indices = @transform_4, window_bounds = array<i64: 1, 512>}, {pipeline_mode = #tpu.pipeline_mode<synchronous>, transform_indices = @transform_5, window_bounds = array<i64: 512, 128>}, {pipeline_mode = #tpu.pipeline_mode<synchronous>, transform_indices = @transform_6, window_bounds = array<i64: 1, 128>}, {transform_indices = @transform_7, window_bounds = array<i64: 8, 128>}]} {
    %c0 = arith.constant 0 : index
    %c0_0 = arith.constant 0 : index
    %0 = vector.load %arg1[%c0, %c0_0] : memref<8x32xf32, #tpu.memory_space<vmem>>, vector<8x32xf32>
    %c0_1 = arith.constant 0 : index
    %c0_2 = arith.constant 0 : index
    %1 = vector.load %arg2[%c0_1, %c0_2] : memref<32x256xf32, #tpu.memory_space<vmem>>, vector<32x256xf32>
    %cst = arith.constant dense<0.000000e+00> : vector<8x256xf32>
    %2 = tpu.matmul %0, %1, %cst {dimension_numbers = #tpu.dot_dimension_numbers<[1], [0], [0], [1], [0, 0, 1, 1], [], []>} : vector<8x32xf32>, vector<32x256xf32>, vector<8x256xf32> -> vector<8x256xf32>
    %c0_3 = arith.constant 0 : index
    %c0_4 = arith.constant 0 : index
    %3 = vector.load %arg3[%c0_3, %c0_4] : memref<1x256xf32, #tpu.memory_space<vmem>>, vector<1x256xf32>
    %4 = vector.broadcast %3 : vector<1x256xf32> to vector<8x256xf32>
    %5 = arith.addf %2, %4 : vector<8x256xf32>
    %cst_5 = arith.constant 0.000000e+00 : f32
    %6 = vector.broadcast %cst_5 : f32 to vector<8x256xf32>
    %7 = arith.cmpf ogt, %5, %6 : vector<8x256xf32>
    %cst_6 = arith.constant 0.00999999977 : f32
    %8 = vector.broadcast %cst_6 : f32 to vector<8x256xf32>
    %9 = arith.mulf %8, %5 : vector<8x256xf32>
    %10 = arith.select %7, %5, %9 : vector<8x256xi1>, vector<8x256xf32>
    %c0_7 = arith.constant 0 : index
    %c0_8 = arith.constant 0 : index
    %11 = vector.load %arg4[%c0_7, %c0_8] : memref<256x512xf32, #tpu.memory_space<vmem>>, vector<256x512xf32>
    %cst_9 = arith.constant dense<0.000000e+00> : vector<8x512xf32>
    %12 = tpu.matmul %10, %11, %cst_9 {dimension_numbers = #tpu.dot_dimension_numbers<[1], [0], [0], [1], [0, 0, 1, 1], [], []>} : vector<8x256xf32>, vector<256x512xf32>, vector<8x512xf32> -> vector<8x512xf32>
    %c0_10 = arith.constant 0 : index
    %c0_11 = arith.constant 0 : index
    %13 = vector.load %arg5[%c0_10, %c0_11] : memref<1x512xf32, #tpu.memory_space<vmem>>, vector<1x512xf32>
    %14 = vector.broadcast %13 : vector<1x512xf32> to vector<8x512xf32>
    %15 = arith.addf %12, %14 : vector<8x512xf32>
    %cst_12 = arith.constant 0.000000e+00 : f32
    %16 = vector.broadcast %cst_12 : f32 to vector<8x512xf32>
    %17 = arith.cmpf ogt, %15, %16 : vector<8x512xf32>
    %cst_13 = arith.constant 0.00999999977 : f32
    %18 = vector.broadcast %cst_13 : f32 to vector<8x512xf32>
    %19 = arith.mulf %18, %15 : vector<8x512xf32>
    %20 = arith.select %17, %15, %19 : vector<8x512xi1>, vector<8x512xf32>
    %c0_14 = arith.constant 0 : index
    %c0_15 = arith.constant 0 : index
    %21 = vector.load %arg6[%c0_14, %c0_15] : memref<512x128xf32, #tpu.memory_space<vmem>>, vector<512x128xf32>
    %cst_16 = arith.constant dense<0.000000e+00> : vector<8x128xf32>
    %22 = tpu.matmul %20, %21, %cst_16 {dimension_numbers = #tpu.dot_dimension_numbers<[1], [0], [0], [1], [0, 0, 1, 1], [], []>} : vector<8x512xf32>, vector<512x128xf32>, vector<8x128xf32> -> vector<8x128xf32>
    %c0_17 = arith.constant 0 : index
    %c0_18 = arith.constant 0 : index
    %23 = vector.load %arg7[%c0_17, %c0_18] : memref<1x128xf32, #tpu.memory_space<vmem>>, vector<1x128xf32>
    %24 = vector.broadcast %23 : vector<1x128xf32> to vector<8x128xf32>
    %25 = arith.addf %22, %24 : vector<8x128xf32>
    %cst_19 = arith.constant 0.000000e+00 : f32
    %26 = vector.broadcast %cst_19 : f32 to vector<8x128xf32>
    %27 = arith.cmpf ogt, %25, %26 : vector<8x128xf32>
    %cst_20 = arith.constant 0.00999999977 : f32
    %28 = vector.broadcast %cst_20 : f32 to vector<8x128xf32>
    %29 = arith.mulf %28, %25 : vector<8x128xf32>
    %30 = arith.select %27, %25, %29 : vector<8x128xi1>, vector<8x128xf32>
    %c0_21 = arith.constant 0 : index
    %c0_22 = arith.constant 0 : index
    %31 = vector.load %arg8[%c0_21, %c0_22] : memref<8x128xf32, #tpu.memory_space<vmem>>, vector<8x128xf32>
    tpu.vector_store %arg8[%c0_21, %c0_22], %30 {strides = array<i32>} : memref<8x128xf32, #tpu.memory_space<vmem>>, vector<8x128xf32>,
    return
  }
  func.func @transform_0(%arg0: i32) -> (i32, i32) {
    %c0_i32 = arith.constant 0 : i32
    %c0_i32_0 = arith.constant 0 : i32
    return %arg0, %c0_i32 : i32, i32
  }
  func.func @transform_1(%arg0: i32) -> (i32, i32) {
    %c0_i32 = arith.constant 0 : i32
    %c0_i32_0 = arith.constant 0 : i32
    %c0_i32_1 = arith.constant 0 : i32
    return %c0_i32, %c0_i32_0 : i32, i32
  }
  func.func @transform_2(%arg0: i32) -> (i32, i32) {
    %c0_i32 = arith.constant 0 : i32
    %c0_i32_0 = arith.constant 0 : i32
    %c0_i32_1 = arith.constant 0 : i32
    return %c0_i32, %c0_i32_0 : i32, i32
  }
  func.func @transform_3(%arg0: i32) -> (i32, i32) {
    %c0_i32 = arith.constant 0 : i32
    %c0_i32_0 = arith.constant 0 : i32
    %c0_i32_1 = arith.constant 0 : i32
    return %c0_i32, %c0_i32_0 : i32, i32
  }
  func.func @transform_4(%arg0: i32) -> (i32, i32) {
    %c0_i32 = arith.constant 0 : i32
    %c0_i32_0 = arith.constant 0 : i32
    %c0_i32_1 = arith.constant 0 : i32
    return %c0_i32, %c0_i32_0 : i32, i32
  }
  func.func @transform_5(%arg0: i32) -> (i32, i32) {
    %c0_i32 = arith.constant 0 : i32
    %c0_i32_0 = arith.constant 0 : i32
    %c0_i32_1 = arith.constant 0 : i32
    return %c0_i32, %c0_i32_0 : i32, i32
  }
  func.func @transform_6(%arg0: i32) -> (i32, i32) {
    %c0_i32 = arith.constant 0 : i32
    %c0_i32_0 = arith.constant 0 : i32
    %c0_i32_1 = arith.constant 0 : i32
    return %c0_i32, %c0_i32_0 : i32, i32
  }
  func.func @transform_7(%arg0: i32) -> (i32, i32) {
    %c0_i32 = arith.constant 0 : i32
    %c0_i32_0 = arith.constant 0 : i32
    return %arg0, %c0_i32 : i32, i32
  }
}

</mosaic_0001>

<bundles_post_ra>
// kernel: tpu_custom_call.1
= control target key start
LH: loop header
LB: loop body
LE: loop exit
PB: predicated region body
PF: predicated region fallthrough
CT: control target
= control target key end

     0   :  { %12 = vsyncpa [#allocation3], 0  ;;  %s933_s0 = inlined_call_operand.hbm [shape: f32[8,32], index: 0, kind: input, shape index: {}]   ;;  %s934_s1 = inlined_call_operand.hbm [shape: f32[32,256], index: 1, kind: input, shape index: {}]   ;;  %s935_s2 = inlined_call_operand.hbm [shape: f32[1,256], index: 2, kind: input, shape index: {}]   ;;  %s936_s3 = inlined_call_operand.hbm [shape: f32[256,512], index: 3, kind: input, shape index: {}]   ;;  %s937_s4 = inlined_call_operand.hbm [shape: f32[1,512], index: 4, kind: input, shape index: {}]   ;;  %s938_s5 = inlined_call_operand.hbm [shape: f32[512,128], index: 5, kind: input, shape index: {}]   ;;  %s939_s6 = inlined_call_operand.vmem [shape: f32[1,128], index: 6, kind: input, shape index: {}]   ;;  %s940_s7 = inlined_call_operand.hbm [shape: f32[8,128], index: 7, kind: output, shape index: {}]  }
   0x1   :  { %13 = vsyncpa [#allocation6], 0 }
   0x2   :  { %14 = vsyncpa [#allocation9], 0 }
   0x3   :  { %15 = vsyncpa [#allocation12], 0  ;;  %s32_s26 = sshll.u32 %s934_s1, 4  ;;  %s33_s26 = int_to_ptr.hbm [resolvable:$true] %s32_s26 }
   0x4   :  { %16 = vsyncpa [#allocation4], 0  ;;  %s856_s27 = smov [#allocation5]   ;;  %s56_s8 = sshll.u32 %s936_s3, 4  ;;  %s57_s8 = int_to_ptr.hbm [resolvable:$true] %s56_s8 }
   0x5   :  { %s34_s28 = sshll.u32 %s856_s27, 4  ;;  %s857_s9 = smov 256   ;;  %s35_s28 = int_to_ptr.vmem [resolvable:$true] %s34_s28 }
   0x6   :  { %s858_s10 = smov 16   ;;  %s859_s11 = smov [#allocation8]  }
   0x7   :  { %40 = dma.hbm_to_vmem [thread:$0]  %s33_s26, 1024, %s35_s28, [#allocation6], %s857_s9, %s857_s9, %s858_s10  }
   0x8   :  { %s58_s12 = sshll.u32 %s859_s11, 4  ;;  %s860_s13 = smov 512   ;;  %s59_s12 = int_to_ptr.vmem [resolvable:$true] %s58_s12 }
   0x9   :  { %s861_s14 = smov 32   ;;  %s22_s16 = sshll.u32 %s933_s0, 4  ;;  %s23_s16 = int_to_ptr.hbm [resolvable:$true] %s22_s16 }
   0xa   :  { %64 = dma.hbm_to_vmem [thread:$0]  %s57_s8, 16384, %s59_s12, [#allocation9], %s860_s13, %s860_s13, %s861_s14  }
   0xb   :  { %s862_s17 = smov [#allocation2]   ;;  %s46_s20 = sshll.u32 %s935_s2, 4  ;;  %s47_s20 = int_to_ptr.hbm [resolvable:$true] %s46_s20 }
   0xc   :  { %s24_s18 = sshll.u32 %s862_s17, 4  ;;  %s863_s21 = smov [#allocation7]   ;;  %s25_s18 = int_to_ptr.vmem [resolvable:$true] %s24_s18 }
   0xd   :  { %27 = dma.hbm_to_vmem [thread:$0]  %s23_s16, 128, %s25_s18, [#allocation3]  }
   0xe   :  { %s48_s22 = sshll.u32 %s863_s21, 4  ;;  %s70_s25 = sshll.u32 %s937_s4, 4  ;;  %s49_s22 = int_to_ptr.vmem [resolvable:$true] %s48_s22  ;;  %s71_s25 = int_to_ptr.hbm [resolvable:$true] %s70_s25 }
   0xf   :  { %51 = dma.hbm_to_vmem [thread:$0]  %s47_s20, 32, %s49_s22, [#allocation6]  }
  0x10   :  { %s80_s27 = sshll.u32 %s938_s5, 4  ;;  %s864_s28 = smov [#allocation10]   ;;  %s81_s27 = int_to_ptr.hbm [resolvable:$true] %s80_s27 }
  0x11   :  { %s72_s29 = sshll.u32 %s864_s28, 4  ;;  %s865_s2 = smov [#allocation11]   ;;  %s73_s29 = int_to_ptr.vmem [resolvable:$true] %s72_s29 }
  0x12   :  { %75 = dma.hbm_to_vmem [thread:$0]  %s71_s25, 64, %s73_s29, [#allocation9]  }
  0x13   :  { %s82_s30 = sshll.u32 %s865_s2, 4  ;;  %s866_s8 = smov 128   ;;  %s83_s30 = int_to_ptr.vmem [resolvable:$true] %s82_s30 }
  0x14   :  { %s867_s9 = smov 8  }
  0x15   :  { %88 = dma.hbm_to_vmem [thread:$0]  %s81_s27, 8192, %s83_s30, [#allocation12], %s866_s8, %s866_s8, %s867_s9  }
  0x16   :  { %846 = dma.done.wait [#allocation3], 128  }
  0x17   :  { %847 = vsyncadd [#allocation3], 4294967168 }
  0x18   :  { %848 = dma.done.wait [#allocation6], 1056  }
  0x19   :  { %849 = vsyncadd [#allocation6], 4294966240 }
  0x1a   :  { %850 = dma.done.wait [#allocation9], 16448  }
  0x1b   :  { %851 = vsyncadd [#allocation9], 4294950848 }
  0x1c   :  { %852 = dma.done.wait [#allocation12], 8192  }
  0x1d   :  { %853 = vsyncadd [#allocation12], 4294959104  ;;  %v122_v0 = vld [vmem:[#allocation5 + $0x30] sm:$0xff]  ;;  %v123_v1 = vld [vmem:[#allocation5 + $0x38] sm:$0xff]  ;;  %vm130_vm0 = vcmask 261120   ;;  %s868_s10 = smov [#allocation13]  }
  0x1e   :  { %v120_v2 = vld [vmem:[#allocation5 + $0x20] sm:$0xff]  ;;  %146 = vmatpush.msra.mxu0 %v122_v0  ;;  %166 = vmatpush.msra.mxu1 %v123_v1  ;;  %v121_v3 = vld [vmem:[#allocation5 + $0x28] sm:$0xff]  ;;  %v118_v4 = vld [vmem:[#allocation5 + $0x10] sm:$0xff]  ;;  %s647_s11 = sshll.u32 %s868_s10, 4  ;;  %s649_s14 = sshll.u32 %s940_s7, 4  ;;  %s648_s11 = int_to_ptr.vmem [resolvable:$true] %s647_s11  ;;  %s650_s14 = int_to_ptr.hbm [resolvable:$true] %s649_s14 }
  0x1f   :  { %v119_v5 = vld [vmem:[#allocation5 + $0x18] sm:$0xff]  ;;  %v116_v6 = vld [vmem:[#allocation5] sm:$0xff]  ;;  %v117_v9 = vld [vmem:[#allocation5 + $0x8] sm:$0xff] }
  0x20   :  { %147 = vmatpush.msra.mxu0 %v120_v2  ;;  %167 = vmatpush.msra.mxu1 %v121_v3  ;;  %v240_v7 = vld [vmem:[#allocation8 + $0x1e0] sm:$0xff]  ;;  %v115_v12 = vld [vmem:[#allocation2] sm:$0xff]  ;;  %v241_v13 = vld [vmem:[#allocation8 + $0x1e8] sm:$0xff] }
  0x21   :  { %v304_v8 = vld [vmem:[#allocation8 + $0x3e0] sm:$0xff]  ;;  %318 = vmatpush.msra.mxu2 %v240_v7  ;;  %v305_v14 = vld [vmem:[#allocation8 + $0x3e8] sm:$0xff]  ;;  %v242_v7 = vld [vmem:[#allocation8 + $0x1f0] sm:$0xff] }
  0x22   :  { %338 = vmatpush.msra.mxu3 %v304_v8  ;;  %v236_v10 = vld [vmem:[#allocation8 + $0x1c0] sm:$0xff]  ;;  %148 = vmatpush.msra.mxu0 %v118_v4  ;;  %v237_v17 = vld [vmem:[#allocation8 + $0x1c8] sm:$0xff]  ;;  %v306_v8 = vld [vmem:[#allocation8 + $0x3f0] sm:$0xff] }
  0x23   :  { %v300_v11 = vld [vmem:[#allocation8 + $0x3c0] sm:$0xff]  ;;  %168 = vmatpush.msra.mxu1 %v119_v5  ;;  %319 = vmatpush.msra.mxu2 %v236_v10  ;;  %v301_v18 = vld [vmem:[#allocation8 + $0x3c8] sm:$0xff] }
  0x24   :  { %339 = vmatpush.msra.mxu3 %v300_v11  ;;  %149 = vmatpush.msra.mxu0 %v116_v6  ;;  %v232_v15 = vld [vmem:[#allocation8 + $0x1a0] sm:$0xff]  ;;  %v233_v21 = vld [vmem:[#allocation8 + $0x1a8] sm:$0xff]  ;;  %v243_v11 = vld [vmem:[#allocation8 + $0x1f8] sm:$0xff] }
  0x25   :  { %169 = vmatpush.msra.mxu1 %v117_v9  ;;  %v296_v16 = vld [vmem:[#allocation8 + $0x3a0] sm:$0xff]  ;;  %662 = vmatmul.msk.f32.vlgmr.msra.gmra.mxu0 %vm130_vm0, %v115_v12  ;;  %v297_v22 = vld [vmem:[#allocation8 + $0x3a8] sm:$0xff] }
  0x26   :  { %663 = vmatmul.msk.f32.vlgmr.msra.gmra.mxu1 %vm130_vm0, %v115_v12  ;;  %358 = vmatpush.msrb.mxu0 %v241_v13  ;;  %v228_v19 = vld [vmem:[#allocation8 + $0x180] sm:$0xff]  ;;  %v229_v25 = vld [vmem:[#allocation8 + $0x188] sm:$0xff]  ;;  %v307_v12 = vld [vmem:[#allocation8 + $0x3f8] sm:$0xff] }
  0x27   :  { %378 = vmatpush.msrb.mxu1 %v305_v14  ;;  %v292_v20 = vld [vmem:[#allocation8 + $0x380] sm:$0xff]  ;;  %320 = vmatpush.msra.mxu2 %v232_v15  ;;  %v293_v26 = vld [vmem:[#allocation8 + $0x388] sm:$0xff]  ;;  %v238_v13 = vld [vmem:[#allocation8 + $0x1d0] sm:$0xff] }
  0x28   :  { %340 = vmatpush.msra.mxu3 %v296_v16  ;;  %359 = vmatpush.msrb.mxu0 %v237_v17  ;;  %v224_v23 = vld [vmem:[#allocation8 + $0x160] sm:$0xff]  ;;  %v225_v29 = vld [vmem:[#allocation8 + $0x168] sm:$0xff]  ;;  %v302_v14 = vld [vmem:[#allocation8 + $0x3d0] sm:$0xff] }
  0x29   :  { %379 = vmatpush.msrb.mxu1 %v301_v18  ;;  %v288_v24 = vld [vmem:[#allocation8 + $0x360] sm:$0xff]  ;;  %321 = vmatpush.msra.mxu2 %v228_v19  ;;  %v289_v30 = vld [vmem:[#allocation8 + $0x368] sm:$0xff]  ;;  %v239_v15 = vld [vmem:[#allocation8 + $0x1d8] sm:$0xff] }
  0x2a   :  { %341 = vmatpush.msra.mxu3 %v292_v20  ;;  %360 = vmatpush.msrb.mxu0 %v233_v21  ;;  %v220_v27 = vld [vmem:[#allocation8 + $0x140] sm:$0xff]  ;;  %v221_v33 = vld [vmem:[#allocation8 + $0x148] sm:$0xff]  ;;  %v303_v16 = vld [vmem:[#allocation8 + $0x3d8] sm:$0xff] }
  0x2b   :  { %380 = vmatpush.msrb.mxu1 %v297_v22  ;;  %v284_v28 = vld [vmem:[#allocation8 + $0x340] sm:$0xff]  ;;  %322 = vmatpush.msra.mxu2 %v224_v23  ;;  %v285_v34 = vld [vmem:[#allocation8 + $0x348] sm:$0xff]  ;;  %v234_v17 = vld [vmem:[#allocation8 + $0x1b0] sm:$0xff] }
  0x2c   :  { %342 = vmatpush.msra.mxu3 %v288_v24  ;;  %361 = vmatpush.msrb.mxu0 %v229_v25  ;;  %v216_v31 = vld [vmem:[#allocation8 + $0x120] sm:$0xff]  ;;  %v217_v37 = vld [vmem:[#allocation8 + $0x128] sm:$0xff]  ;;  %v298_v18 = vld [vmem:[#allocation8 + $0x3b0] sm:$0xff] }
  0x2d   :  { %381 = vmatpush.msrb.mxu1 %v293_v26  ;;  %v280_v32 = vld [vmem:[#allocation8 + $0x320] sm:$0xff]  ;;  %323 = vmatpush.msra.mxu2 %v220_v27  ;;  %v281_v38 = vld [vmem:[#allocation8 + $0x328] sm:$0xff]  ;;  %v235_v19 = vld [vmem:[#allocation8 + $0x1b8] sm:$0xff] }
  0x2e   :  { %343 = vmatpush.msra.mxu3 %v284_v28  ;;  %362 = vmatpush.msrb.mxu0 %v225_v29  ;;  %v212_v35 = vld [vmem:[#allocation8 + $0x100] sm:$0xff]  ;;  %v213_v41 = vld [vmem:[#allocation8 + $0x108] sm:$0xff]  ;;  %v299_v20 = vld [vmem:[#allocation8 + $0x3b8] sm:$0xff] }
  0x2f   :  { %382 = vmatpush.msrb.mxu1 %v289_v30  ;;  %v276_v36 = vld [vmem:[#allocation8 + $0x300] sm:$0xff]  ;;  %324 = vmatpush.msra.mxu2 %v216_v31  ;;  %v277_v42 = vld [vmem:[#allocation8 + $0x308] sm:$0xff]  ;;  %v230_v21 = vld [vmem:[#allocation8 + $0x190] sm:$0xff] }
  0x30   :  { %344 = vmatpush.msra.mxu3 %v280_v32  ;;  %363 = vmatpush.msrb.mxu0 %v221_v33  ;;  %v208_v39 = vld [vmem:[#allocation8 + $0xe0] sm:$0xff]  ;;  %v209_v45 = vld [vmem:[#allocation8 + $0xe8] sm:$0xff]  ;;  %v294_v22 = vld [vmem:[#allocation8 + $0x390] sm:$0xff] }
  0x31   :  { %383 = vmatpush.msrb.mxu1 %v285_v34  ;;  %v272_v40 = vld [vmem:[#allocation8 + $0x2e0] sm:$0xff]  ;;  %325 = vmatpush.msra.mxu2 %v212_v35  ;;  %v273_v46 = vld [vmem:[#allocation8 + $0x2e8] sm:$0xff]  ;;  %v231_v23 = vld [vmem:[#allocation8 + $0x198] sm:$0xff] }
  0x32   :  { %345 = vmatpush.msra.mxu3 %v276_v36  ;;  %364 = vmatpush.msrb.mxu0 %v217_v37  ;;  %v204_v43 = vld [vmem:[#allocation8 + $0xc0] sm:$0xff]  ;;  %v205_v49 = vld [vmem:[#allocation8 + $0xc8] sm:$0xff]  ;;  %v295_v24 = vld [vmem:[#allocation8 + $0x398] sm:$0xff] }
  0x33   :  { %384 = vmatpush.msrb.mxu1 %v281_v38  ;;  %v268_v44 = vld [vmem:[#allocation8 + $0x2c0] sm:$0xff]  ;;  %326 = vmatpush.msra.mxu2 %v208_v39  ;;  %v269_v50 = vld [vmem:[#allocation8 + $0x2c8] sm:$0xff]  ;;  %v226_v25 = vld [vmem:[#allocation8 + $0x170] sm:$0xff] }
  0x34   :  { %346 = vmatpush.msra.mxu3 %v272_v40  ;;  %365 = vmatpush.msrb.mxu0 %v213_v41  ;;  %v200_v47 = vld [vmem:[#allocation8 + $0xa0] sm:$0xff]  ;;  %v201_v53 = vld [vmem:[#allocation8 + $0xa8] sm:$0xff]  ;;  %v290_v26 = vld [vmem:[#allocation8 + $0x370] sm:$0xff] }
  0x35   :  { %385 = vmatpush.msrb.mxu1 %v277_v42  ;;  %v264_v48 = vld [vmem:[#allocation8 + $0x2a0] sm:$0xff]  ;;  %327 = vmatpush.msra.mxu2 %v204_v43  ;;  %v265_v54 = vld [vmem:[#allocation8 + $0x2a8] sm:$0xff]  ;;  %v227_v27 = vld [vmem:[#allocation8 + $0x178] sm:$0xff] }
  0x36   :  { %347 = vmatpush.msra.mxu3 %v268_v44  ;;  %366 = vmatpush.msrb.mxu0 %v209_v45  ;;  %v196_v51 = vld [vmem:[#allocation8 + $0x80] sm:$0xff]  ;;  %v197_v57 = vld [vmem:[#allocation8 + $0x88] sm:$0xff]  ;;  %v291_v28 = vld [vmem:[#allocation8 + $0x378] sm:$0xff] }
  0x37   :  { %386 = vmatpush.msrb.mxu1 %v273_v46  ;;  %v260_v52 = vld [vmem:[#allocation8 + $0x280] sm:$0xff]  ;;  %328 = vmatpush.msra.mxu2 %v200_v47  ;;  %v261_v58 = vld [vmem:[#allocation8 + $0x288] sm:$0xff]  ;;  %v222_v29 = vld [vmem:[#allocation8 + $0x150] sm:$0xff] }
  0x38   :  { %348 = vmatpush.msra.mxu3 %v264_v48  ;;  %367 = vmatpush.msrb.mxu0 %v205_v49  ;;  %v192_v55 = vld [vmem:[#allocation8 + $0x60] sm:$0xff]  ;;  %v193_v61 = vld [vmem:[#allocation8 + $0x68] sm:$0xff]  ;;  %v286_v30 = vld [vmem:[#allocation8 + $0x350] sm:$0xff] }
  0x39   :  { %387 = vmatpush.msrb.mxu1 %v269_v50  ;;  %v256_v56 = vld [vmem:[#allocation8 + $0x260] sm:$0xff]  ;;  %329 = vmatpush.msra.mxu2 %v196_v51  ;;  %v257_v62 = vld [vmem:[#allocation8 + $0x268] sm:$0xff]  ;;  %v223_v31 = vld [vmem:[#allocation8 + $0x158] sm:$0xff] }
  0x3a   :  { %349 = vmatpush.msra.mxu3 %v260_v52  ;;  %368 = vmatpush.msrb.mxu0 %v201_v53  ;;  %v188_v59 = vld [vmem:[#allocation8 + $0x40] sm:$0xff]  ;;  %v189_v1 = vld [vmem:[#allocation8 + $0x48] sm:$0xff]  ;;  %v287_v32 = vld [vmem:[#allocation8 + $0x358] sm:$0xff] }
  0x3b   :  { %388 = vmatpush.msrb.mxu1 %v265_v54  ;;  %v252_v60 = vld [vmem:[#allocation8 + $0x240] sm:$0xff]  ;;  %330 = vmatpush.msra.mxu2 %v192_v55  ;;  %v253_v2 = vld [vmem:[#allocation8 + $0x248] sm:$0xff]  ;;  %v218_v33 = vld [vmem:[#allocation8 + $0x130] sm:$0xff] }
  0x3c   :  { %350 = vmatpush.msra.mxu3 %v256_v56  ;;  %369 = vmatpush.msrb.mxu0 %v197_v57  ;;  %v184_v63 = vld [vmem:[#allocation8 + $0x20] sm:$0xff]  ;;  %v185_v5 = vld [vmem:[#allocation8 + $0x28] sm:$0xff]  ;;  %v282_v34 = vld [vmem:[#allocation8 + $0x330] sm:$0xff] }
  0x3d   :  { %389 = vmatpush.msrb.mxu1 %v261_v58  ;;  %v248_v0 = vld [vmem:[#allocation8 + $0x220] sm:$0xff]  ;;  %331 = vmatpush.msra.mxu2 %v188_v59  ;;  %v249_v6 = vld [vmem:[#allocation8 + $0x228] sm:$0xff]  ;;  %v219_v35 = vld [vmem:[#allocation8 + $0x138] sm:$0xff] }
  0x3e   :  { %351 = vmatpush.msra.mxu3 %v252_v60  ;;  %370 = vmatpush.msrb.mxu0 %v193_v61  ;;  %v180_v3 = vld [vmem:[#allocation8] sm:$0xff]  ;;  %v181_v9 = vld [vmem:[#allocation8 + $0x8] sm:$0xff]  ;;  %v283_v36 = vld [vmem:[#allocation8 + $0x338] sm:$0xff] }
  0x3f   :  { %390 = vmatpush.msrb.mxu1 %v257_v62  ;;  %v244_v4 = vld [vmem:[#allocation8 + $0x200] sm:$0xff]  ;;  %332 = vmatpush.msra.mxu2 %v184_v63  ;;  %v245_v10 = vld [vmem:[#allocation8 + $0x208] sm:$0xff]  ;;  %v214_v37 = vld [vmem:[#allocation8 + $0x110] sm:$0xff] }
  0x40   :  { %352 = vmatpush.msra.mxu3 %v248_v0  ;;  %371 = vmatpush.msrb.mxu0 %v189_v1  ;;  %v278_v38 = vld [vmem:[#allocation8 + $0x310] sm:$0xff]  ;;  %v215_v39 = vld [vmem:[#allocation8 + $0x118] sm:$0xff] }
  0x41   :  { %391 = vmatpush.msrb.mxu1 %v253_v2  ;;  %333 = vmatpush.msra.mxu2 %v180_v3  ;;  %v279_v40 = vld [vmem:[#allocation8 + $0x318] sm:$0xff]  ;;  %v210_v41 = vld [vmem:[#allocation8 + $0xf0] sm:$0xff] }
  0x42   :  { %353 = vmatpush.msra.mxu3 %v244_v4  ;;  %372 = vmatpush.msrb.mxu0 %v185_v5  ;;  %v274_v42 = vld [vmem:[#allocation8 + $0x2f0] sm:$0xff]  ;;  %v211_v43 = vld [vmem:[#allocation8 + $0xf8] sm:$0xff] }
  0x43   :  { %392 = vmatpush.msrb.mxu1 %v249_v6  ;;  %398 = vmatpush.msrb.mxu2 %v242_v7  ;;  %v275_v44 = vld [vmem:[#allocation8 + $0x2f8] sm:$0xff]  ;;  %v206_v45 = vld [vmem:[#allocation8 + $0xd0] sm:$0xff] }
  0x44   :  { %418 = vmatpush.msrb.mxu3 %v306_v8  ;;  %373 = vmatpush.msrb.mxu0 %v181_v9  ;;  %v270_v46 = vld [vmem:[#allocation8 + $0x2d0] sm:$0xff]  ;;  %v207_v47 = vld [vmem:[#allocation8 + $0xd8] sm:$0xff] }
  0x45   :  { %393 = vmatpush.msrb.mxu1 %v245_v10  ;;  %399 = vmatpush.msrb.mxu2 %v238_v13  ;;  %v271_v48 = vld [vmem:[#allocation8 + $0x2d8] sm:$0xff]  ;;  %v202_v49 = vld [vmem:[#allocation8 + $0xb0] sm:$0xff] }
  0x46   :  { %438 = vmatpush.msra.mxu0 %v243_v11  ;;  %419 = vmatpush.msrb.mxu3 %v302_v14  ;;  %v266_v50 = vld [vmem:[#allocation8 + $0x2b0] sm:$0xff]  ;;  %v203_v51 = vld [vmem:[#allocation8 + $0xb8] sm:$0xff] }
  0x47   :  { %458 = vmatpush.msra.mxu1 %v307_v12  ;;  %400 = vmatpush.msrb.mxu2 %v234_v17  ;;  %v267_v52 = vld [vmem:[#allocation8 + $0x2b8] sm:$0xff]  ;;  %v198_v53 = vld [vmem:[#allocation8 + $0x90] sm:$0xff] }
  0x48   :  { %439 = vmatpush.msra.mxu0 %v239_v15  ;;  %420 = vmatpush.msrb.mxu3 %v298_v18  ;;  %v262_v54 = vld [vmem:[#allocation8 + $0x290] sm:$0xff]  ;;  %v199_v55 = vld [vmem:[#allocation8 + $0x98] sm:$0xff] }
  0x49   :  { %459 = vmatpush.msra.mxu1 %v303_v16  ;;  %401 = vmatpush.msrb.mxu2 %v230_v21  ;;  %v263_v56 = vld [vmem:[#allocation8 + $0x298] sm:$0xff]  ;;  %v194_v57 = vld [vmem:[#allocation8 + $0x70] sm:$0xff] }
  0x4a   :  { %440 = vmatpush.msra.mxu0 %v235_v19  ;;  %421 = vmatpush.msrb.mxu3 %v294_v22  ;;  %v258_v58 = vld [vmem:[#allocation8 + $0x270] sm:$0xff]  ;;  %v195_v59 = vld [vmem:[#allocation8 + $0x78] sm:$0xff] }
  0x4b   :  { %460 = vmatpush.msra.mxu1 %v299_v20  ;;  %402 = vmatpush.msrb.mxu2 %v226_v25  ;;  %v259_v60 = vld [vmem:[#allocation8 + $0x278] sm:$0xff]  ;;  %v190_v61 = vld [vmem:[#allocation8 + $0x50] sm:$0xff] }
  0x4c   :  { %441 = vmatpush.msra.mxu0 %v231_v23  ;;  %422 = vmatpush.msrb.mxu3 %v290_v26  ;;  %v254_v62 = vld [vmem:[#allocation8 + $0x250] sm:$0xff]  ;;  %v191_v63 = vld [vmem:[#allocation8 + $0x58] sm:$0xff] }
  0x4d   :  { %461 = vmatpush.msra.mxu1 %v295_v24  ;;  %403 = vmatpush.msrb.mxu2 %v222_v29  ;;  %v255_v0 = vld [vmem:[#allocation8 + $0x258] sm:$0xff]  ;;  %v186_v1 = vld [vmem:[#allocation8 + $0x30] sm:$0xff] }
  0x4e   :  { %442 = vmatpush.msra.mxu0 %v227_v27  ;;  %423 = vmatpush.msrb.mxu3 %v286_v30  ;;  %v250_v2 = vld [vmem:[#allocation8 + $0x230] sm:$0xff]  ;;  %v187_v3 = vld [vmem:[#allocation8 + $0x38] sm:$0xff] }
  0x4f   :  { %462 = vmatpush.msra.mxu1 %v291_v28  ;;  %404 = vmatpush.msrb.mxu2 %v218_v33  ;;  %v251_v4 = vld [vmem:[#allocation8 + $0x238] sm:$0xff]  ;;  %v182_v5 = vld [vmem:[#allocation8 + $0x10] sm:$0xff]  ;;  %v502_v33 = vld [vmem:[#allocation11 + $0x60] sm:$0xff] }
  0x50   :  { %443 = vmatpush.msra.mxu0 %v223_v31  ;;  %424 = vmatpush.msrb.mxu3 %v282_v34  ;;  %v246_v6 = vld [vmem:[#allocation8 + $0x210] sm:$0xff]  ;;  %v183_v7 = vld [vmem:[#allocation8 + $0x18] sm:$0xff]  ;;  %v550_v34 = vld [vmem:[#allocation11 + $0x1e0] sm:$0xff] }
  0x51   :  { %463 = vmatpush.msra.mxu1 %v287_v32  ;;  %405 = vmatpush.msrb.mxu2 %v214_v37  ;;  %v247_v8 = vld [vmem:[#allocation8 + $0x218] sm:$0xff]  ;;  %v519_v28 = vld [vmem:[#allocation11 + $0xe8] sm:$0xff]  ;;  %v518_v32 = vld [vmem:[#allocation11 + $0xe0] sm:$0xff] }
  0x52   :  { %444 = vmatpush.msra.mxu0 %v219_v35  ;;  %425 = vmatpush.msrb.mxu3 %v278_v38  ;;  %v124_v9 = vld [vmem:[#allocation7] sm:$0x3]  ;;  %v520_v24 = vld [vmem:[#allocation11 + $0xf0] sm:$0xff]  ;;  %v503_v29 = vld [vmem:[#allocation11 + $0x68] sm:$0xff] }
  0x53   :  { %464 = vmatpush.msra.mxu1 %v283_v36  ;;  %406 = vmatpush.msrb.mxu2 %v210_v41  ;;  %v126_v10 = vperm.slane %v124_v9, 0  ;;  %v127_v11 = vperm.slane %v124_v9, 1  ;;  %v521_v20 = vld [vmem:[#allocation11 + $0xf8] sm:$0xff]  ;;  %v504_v25 = vld [vmem:[#allocation11 + $0x70] sm:$0xff]  ;;  %v551_v30 = vld [vmem:[#allocation11 + $0x1e8] sm:$0xff] }
  0x54   :  { %445 = vmatpush.msra.mxu0 %v215_v39  ;;  %426 = vmatpush.msrb.mxu3 %v274_v42  ;;  %v505_v21 = vld [vmem:[#allocation11 + $0x78] sm:$0xff]  ;;  %v552_v26 = vld [vmem:[#allocation11 + $0x1f0] sm:$0xff]  ;;  %v535_v31 = vld [vmem:[#allocation11 + $0x168] sm:$0xff] }
  0x55   :  { %465 = vmatpush.msra.mxu1 %v279_v40  ;;  %407 = vmatpush.msrb.mxu2 %v206_v45  ;;  %v553_v22 = vld [vmem:[#allocation11 + $0x1f8] sm:$0xff]  ;;  %v536_v27 = vld [vmem:[#allocation11 + $0x170] sm:$0xff]  ;;  %v534_v35 = vld [vmem:[#allocation11 + $0x160] sm:$0xff] }
  0x56   :  { %446 = vmatpush.msra.mxu0 %v211_v43  ;;  %427 = vmatpush.msrb.mxu3 %v270_v46  ;;  %v537_v23 = vld [vmem:[#allocation11 + $0x178] sm:$0xff]  ;;  %v516_v40 = vld [vmem:[#allocation11 + $0xd0] sm:$0xff]  ;;  %v515_v43 = vld [vmem:[#allocation11 + $0xc8] sm:$0xff] }
  0x57   :  { %466 = vmatpush.msra.mxu1 %v275_v44  ;;  %408 = vmatpush.msrb.mxu2 %v202_v49  ;;  %v517_v36 = vld [vmem:[#allocation11 + $0xd8] sm:$0xff]  ;;  %v500_v41 = vld [vmem:[#allocation11 + $0x50] sm:$0xff]  ;;  %v499_v44 = vld [vmem:[#allocation11 + $0x48] sm:$0xff] }
  0x58   :  { %447 = vmatpush.msra.mxu0 %v207_v47  ;;  %428 = vmatpush.msrb.mxu3 %v266_v50  ;;  %v501_v37 = vld [vmem:[#allocation11 + $0x58] sm:$0xff]  ;;  %v548_v42 = vld [vmem:[#allocation11 + $0x1d0] sm:$0xff]  ;;  %v547_v45 = vld [vmem:[#allocation11 + $0x1c8] sm:$0xff] }
  0x59   :  { %467 = vmatpush.msra.mxu1 %v271_v48  ;;  %409 = vmatpush.msrb.mxu2 %v198_v53  ;;  %v549_v38 = vld [vmem:[#allocation11 + $0x1d8] sm:$0xff]  ;;  %v514_v46 = vld [vmem:[#allocation11 + $0xc0] sm:$0xff]  ;;  %v491_v9 = vld [vmem:[#allocation11 + $0x8] sm:$0xff] }
  0x5a   :  { %448 = vmatpush.msra.mxu0 %v203_v51  ;;  %429 = vmatpush.msrb.mxu3 %v262_v54  ;;  %v533_v39 = vld [vmem:[#allocation11 + $0x158] sm:$0xff]  ;;  %v498_v47 = vld [vmem:[#allocation11 + $0x40] sm:$0xff]  ;;  %v512_v51 = vld [vmem:[#allocation11 + $0xb0] sm:$0xff] }
  0x5b   :  { %468 = vmatpush.msra.mxu1 %v267_v52  ;;  %410 = vmatpush.msrb.mxu2 %v194_v57  ;;  %v546_v48 = vld [vmem:[#allocation11 + $0x1c0] sm:$0xff]  ;;  %v513_v49 = vld [vmem:[#allocation11 + $0xb8] sm:$0xff]  ;;  %v511_v52 = vld [vmem:[#allocation11 + $0xa8] sm:$0xff] }
  0x5c   :  { %449 = vmatpush.msra.mxu0 %v199_v55  ;;  %430 = vmatpush.msrb.mxu3 %v258_v58  ;;  %v497_v50 = vld [vmem:[#allocation11 + $0x38] sm:$0xff]  ;;  %v510_v53 = vld [vmem:[#allocation11 + $0xa0] sm:$0xff]  ;;  %v496_v54 = vld [vmem:[#allocation11 + $0x30] sm:$0xff] }
  0x5d   :  { %469 = vmatpush.msra.mxu1 %v263_v56  ;;  %411 = vmatpush.msrb.mxu2 %v190_v61  ;;  %v509_v55 = vld [vmem:[#allocation11 + $0x98] sm:$0xff]  ;;  %v532_v56 = vld [vmem:[#allocation11 + $0x150] sm:$0xff]  ;;  %v495_v58 = vld [vmem:[#allocation11 + $0x28] sm:$0xff] }
  0x5e   :  { %450 = vmatpush.msra.mxu0 %v195_v59  ;;  %431 = vmatpush.msrb.mxu3 %v254_v62  ;;  %v545_v57 = vld [vmem:[#allocation11 + $0x1b8] sm:$0xff]  ;;  %v508_v59 = vld [vmem:[#allocation11 + $0x90] sm:$0xff]  ;;  %v494_v62 = vld [vmem:[#allocation11 + $0x20] sm:$0xff] }
  0x5f   :  { %470 = vmatpush.msra.mxu1 %v259_v60  ;;  %412 = vmatpush.msrb.mxu2 %v186_v1  ;;  %v531_v60 = vld [vmem:[#allocation11 + $0x148] sm:$0xff]  ;;  %v544_v61 = vld [vmem:[#allocation11 + $0x1b0] sm:$0xff] }
  0x60   :  { %451 = vmatpush.msra.mxu0 %v191_v63  ;;  %432 = vmatpush.msrb.mxu3 %v250_v2  ;;  %v507_v63 = vld [vmem:[#allocation11 + $0x88] sm:$0xff]  ;;  %v493_v2 = vld [vmem:[#allocation11 + $0x18] sm:$0xff] }
  0x61   :  { %471 = vmatpush.msra.mxu1 %v255_v0  ;;  %413 = vmatpush.msrb.mxu2 %v182_v5  ;;  %v530_v0 = vld [vmem:[#allocation11 + $0x140] sm:$0xff]  ;;  %v543_v1 = vld [vmem:[#allocation11 + $0x1a8] sm:$0xff] }
  0x62   :  { %452 = vmatpush.msra.mxu0 %v187_v3  ;;  %433 = vmatpush.msrb.mxu3 %v246_v6  ;;  %v506_v3 = vld [vmem:[#allocation11 + $0x80] sm:$0xff]  ;;  %v492_v6 = vld [vmem:[#allocation11 + $0x10] sm:$0xff] }
  0x63   :  { %472 = vmatpush.msra.mxu1 %v251_v4  ;;  %v529_v4 = vld [vmem:[#allocation11 + $0x138] sm:$0xff]  ;;  %v542_v5 = vld [vmem:[#allocation11 + $0x1a0] sm:$0xff] }
  0x64   :  { %453 = vmatpush.msra.mxu0 %v183_v7  ;;  %v528_v7 = vld [vmem:[#allocation11 + $0x130] sm:$0xff] }
  0x65   :  { %473 = vmatpush.msra.mxu1 %v247_v8  ;;  %v541_v8 = vld [vmem:[#allocation11 + $0x198] sm:$0xff] }
  0xa2   :  { %v151_v12 = vpop.f32.mrf.mxu0 }
  0xa3   :  { %v171_v13 = vpop.f32.mrf.mxu1  ;;  %v152_v14 = vadd.f32 %v151_v12, %v126_v10  ;;  %v527_v10 = vld [vmem:[#allocation11 + $0x128] sm:$0xff]  ;;  %v490_v12 = vld [vmem:[#allocation11] sm:$0xff] }
  0xa4   :  { %v172_v15 = vadd.f32 %v171_v13, %v127_v11  ;;  %v540_v11 = vld [vmem:[#allocation11 + $0x190] sm:$0xff]  ;;  %v526_v13 = vld [vmem:[#allocation11 + $0x120] sm:$0xff] }
  0xa5   :  { %vm174_vm1 = vcmp.gt.f32.partialorder %v152_v14, 0.0  ;;  %v176_v16 = vmul.f32 0.01, %v152_v14 }
  0xa6   :  { %vm175_vm2 = vcmp.gt.f32.partialorder %v172_v15, 0.0  ;;  %v177_v17 = vmul.f32 0.01, %v172_v15 }
  0xa7   :  { %v178_v18 = vsel %vm174_vm1, %v152_v14, %v176_v16  ;;  %v539_v14 = vld [vmem:[#allocation11 + $0x188] sm:$0xff]  ;;  %v538_v16 = vld [vmem:[#allocation11 + $0x180] sm:$0xff] }
  0xa8   :  { %v179_v19 = vsel %vm175_vm2, %v172_v15, %v177_v17  ;;  %334 = vmatmul.f32.vlgmr.msra.gmra.mxu2 %v178_v18  ;;  %374 = vmatmul.f32.vlgmr.msrb.gmra.mxu0 %v178_v18  ;;  %v525_v15 = vld [vmem:[#allocation11 + $0x118] sm:$0xff]  ;;  %v524_v17 = vld [vmem:[#allocation11 + $0x110] sm:$0xff] }
  0xa9   :  { %354 = vmatmul.f32.vlgmr.msra.gmra.mxu3 %v179_v19  ;;  %394 = vmatmul.f32.vlgmr.msrb.gmra.mxu1 %v179_v19 }
  0xaa   :  { %578 = vmatpush.msra.mxu3 %v521_v20  ;;  %558 = vmatpush.msra.mxu2 %v505_v21  ;;  %v308_v20 = vld [vmem:[#allocation10] sm:$0xf] }
  0xab   :  { %618 = vmatpush.msrb.mxu1 %v553_v22  ;;  %598 = vmatpush.msrb.mxu0 %v537_v23  ;;  %v311_v21 = vperm.slane %v308_v20, 1 }
  0xac   :  { %579 = vmatpush.msra.mxu3 %v520_v24  ;;  %559 = vmatpush.msra.mxu2 %v504_v25  ;;  %v310_v25 = vperm.slane %v308_v20, 0 }
  0xad   :  { %619 = vmatpush.msrb.mxu1 %v552_v26  ;;  %599 = vmatpush.msrb.mxu0 %v536_v27 }
  0xae   :  { %580 = vmatpush.msra.mxu3 %v519_v28  ;;  %560 = vmatpush.msra.mxu2 %v503_v29 }
  0xaf   :  { %620 = vmatpush.msrb.mxu1 %v551_v30  ;;  %600 = vmatpush.msrb.mxu0 %v535_v31  ;;  %v313_v30 = vperm.slane %v308_v20, 3 }
  0xb0   :  { %414 = vmatmul.f32.vlgmr.msrb.gmra.mxu2 %v178_v18  ;;  %454 = vmatmul.f32.vlgmr.msra.gmra.mxu0 %v178_v18  ;;  %v523_v18 = vld [vmem:[#allocation11 + $0x108] sm:$0xff] }
  0xb1   :  { %434 = vmatmul.f32.vlgmr.msrb.gmra.mxu3 %v179_v19  ;;  %474 = vmatmul.f32.vlgmr.msra.gmra.mxu1 %v179_v19  ;;  %v522_v19 = vld [vmem:[#allocation11 + $0x100] sm:$0xff] }
  0xb2   :  { %581 = vmatpush.msra.mxu3 %v518_v32  ;;  %561 = vmatpush.msra.mxu2 %v502_v33 }
  0xb3   :  { %621 = vmatpush.msrb.mxu1 %v550_v34  ;;  %601 = vmatpush.msrb.mxu0 %v534_v35 }
  0xb4   :  { %582 = vmatpush.msra.mxu3 %v517_v36  ;;  %562 = vmatpush.msra.mxu2 %v501_v37 }
  0xb5   :  { %622 = vmatpush.msrb.mxu1 %v549_v38  ;;  %602 = vmatpush.msrb.mxu0 %v533_v39  ;;  %v312_v38 = vperm.slane %v308_v20, 2 }
  0xb6   :  { %583 = vmatpush.msra.mxu3 %v516_v40  ;;  %563 = vmatpush.msra.mxu2 %v500_v41 }
  0xb7   :  { %623 = vmatpush.msrb.mxu1 %v548_v42  ;;  %603 = vmatpush.msrb.mxu0 %v532_v56 }
  0xb8   :  { %584 = vmatpush.msra.mxu3 %v515_v43  ;;  %564 = vmatpush.msra.mxu2 %v499_v44 }
  0xb9   :  { %624 = vmatpush.msrb.mxu1 %v547_v45  ;;  %604 = vmatpush.msrb.mxu0 %v531_v60 }
  0xba   :  { %585 = vmatpush.msra.mxu3 %v514_v46  ;;  %565 = vmatpush.msra.mxu2 %v498_v47 }
  0xbb   :  { %625 = vmatpush.msrb.mxu1 %v546_v48  ;;  %605 = vmatpush.msrb.mxu0 %v530_v0 }
  0xbc   :  { %586 = vmatpush.msra.mxu3 %v513_v49  ;;  %566 = vmatpush.msra.mxu2 %v497_v50  ;;  %v677_v49 = vld [vmem:[%s939_s6] ss:$0 sm:$0xff] }
  0xbd   :  { %626 = vmatpush.msrb.mxu1 %v545_v57  ;;  %606 = vmatpush.msrb.mxu0 %v529_v4 }
  0xbe   :  { %587 = vmatpush.msra.mxu3 %v512_v51  ;;  %567 = vmatpush.msra.mxu2 %v496_v54 }
  0xbf   :  { %627 = vmatpush.msrb.mxu1 %v544_v61  ;;  %607 = vmatpush.msrb.mxu0 %v528_v7 }
  0xc0   :  { %588 = vmatpush.msra.mxu3 %v511_v52  ;;  %568 = vmatpush.msra.mxu2 %v495_v58 }
  0xc1   :  { %628 = vmatpush.msrb.mxu1 %v543_v1  ;;  %608 = vmatpush.msrb.mxu0 %v527_v10 }
  0xc2   :  { %589 = vmatpush.msra.mxu3 %v510_v53  ;;  %569 = vmatpush.msra.mxu2 %v494_v62 }
  0xc3   :  { %629 = vmatpush.msrb.mxu1 %v542_v5  ;;  %609 = vmatpush.msrb.mxu0 %v526_v13 }
  0xc4   :  { %590 = vmatpush.msra.mxu3 %v509_v55  ;;  %570 = vmatpush.msra.mxu2 %v493_v2 }
  0xc5   :  { %630 = vmatpush.msrb.mxu1 %v541_v8  ;;  %610 = vmatpush.msrb.mxu0 %v525_v15 }
  0xc6   :  { %591 = vmatpush.msra.mxu3 %v508_v59  ;;  %571 = vmatpush.msra.mxu2 %v492_v6 }
  0xc7   :  { %631 = vmatpush.msrb.mxu1 %v540_v11  ;;  %611 = vmatpush.msrb.mxu0 %v524_v17 }
  0xc8   :  { %592 = vmatpush.msra.mxu3 %v507_v63  ;;  %572 = vmatpush.msra.mxu2 %v491_v9 }
  0xc9   :  { %632 = vmatpush.msrb.mxu1 %v539_v14  ;;  %612 = vmatpush.msrb.mxu0 %v523_v18 }
  0xca   :  { %593 = vmatpush.msra.mxu3 %v506_v3  ;;  %573 = vmatpush.msra.mxu2 %v490_v12 }
  0xcb   :  { %633 = vmatpush.msrb.mxu1 %v538_v16  ;;  %613 = vmatpush.msrb.mxu0 %v522_v19 }
 0x125   :  { %v375_v22 = vpop.f32.mrf.mxu0 }
 0x126   :  { %v395_v23 = vpop.f32.mrf.mxu1  ;;  %v376_v24 = vadd.f32 %v375_v22, %v311_v21 }
 0x128   :  { %v396_v26 = vadd.f32 %v395_v23, %v376_v24 }
 0x12a   :  { %vm479_vm3 = vcmp.gt.f32.partialorder %v396_v26, 0.0  ;;  %v483_v27 = vmul.f32 0.01, %v396_v26 }
 0x12b   :  { %v335_v28 = vpop.f32.mrf.mxu2 }
 0x12c   :  { %v355_v29 = vpop.f32.mrf.mxu3  ;;  %v336_v31 = vadd.f32 %v335_v28, %v310_v25  ;;  %v487_v32 = vsel %vm479_vm3, %v396_v26, %v483_v27 }
 0x12d   :  { %v455_v34 = vpop.f32.mrf.mxu0  ;;  %594 = vmatmul.f32.vlgmr.msra.gmra.mxu3 %v487_v32 }
 0x12e   :  { %v356_v33 = vadd.f32 %v355_v29, %v336_v31  ;;  %v456_v35 = vadd.f32 %v455_v34, %v313_v30  ;;  %v475_v37 = vpop.f32.mrf.mxu1 }
 0x130   :  { %vm478_vm4 = vcmp.gt.f32.partialorder %v356_v33, 0.0  ;;  %v482_v36 = vmul.f32 0.01, %v356_v33  ;;  %v476_v39 = vadd.f32 %v475_v37, %v456_v35 }
 0x132   :  { %v486_v40 = vsel %vm478_vm4, %v356_v33, %v482_v36  ;;  %vm481_vm5 = vcmp.gt.f32.partialorder %v476_v39, 0.0  ;;  %v485_v41 = vmul.f32 0.01, %v476_v39 }
 0x133   :  { %v415_v42 = vpop.f32.mrf.mxu2  ;;  %574 = vmatmul.f32.vlgmr.msra.gmra.mxu2 %v486_v40 }
 0x134   :  { %v416_v43 = vadd.f32 %v415_v42, %v312_v38  ;;  %v435_v44 = vpop.f32.mrf.mxu3  ;;  %v489_v45 = vsel %vm481_vm5, %v476_v39, %v485_v41 }
 0x135   :  { %634 = vmatmul.f32.vlgmr.msrb.gmra.mxu1 %v489_v45 }
 0x136   :  { %v436_v46 = vadd.f32 %v435_v44, %v416_v43 }
 0x138   :  { %vm480_vm6 = vcmp.gt.f32.partialorder %v436_v46, 0.0  ;;  %v484_v47 = vmul.f32 0.01, %v436_v46 }
 0x13a   :  { %v488_v48 = vsel %vm480_vm6, %v436_v46, %v484_v47 }
 0x13b   :  { %614 = vmatmul.f32.vlgmr.msrb.gmra.mxu0 %v488_v48 }
 0x1b0   :  { %v595_v52 = vpop.f32.mrf.mxu3 }
 0x1b2   :  { %v635_v56 = vpop.f32.mrf.mxu1 }
 0x1b6   :  { %v575_v50 = vpop.f32.mrf.mxu2 }
 0x1b7   :  { %v576_v51 = vadd.f32 %v677_v49, %v575_v50 }
 0x1b8   :  { %v615_v54 = vpop.f32.mrf.mxu0 }
 0x1b9   :  { %v596_v53 = vadd.f32 %v595_v52, %v576_v51 }
 0x1bb   :  { %v616_v55 = vadd.f32 %v615_v54, %v596_v53 }
 0x1bd   :  { %v636_v57 = vadd.f32 %v635_v56, %v616_v55 }
 0x1bf   :  { %v639_v58 = vmul.f32 0.01, %v636_v57  ;;  %vm638_vm7 = vcmp.gt.f32.partialorder %v636_v57, 0.0 }
 0x1c1   :  { %v640_v59 = vsel %vm638_vm7, %v636_v57, %v639_v58 }
 0x1c2   :  { %641 = vst [vmem:[#allocation13] sm:$0xff] %v640_v59 }
 0x1c3   :  { %652 = dma.vmem_to_hbm [thread:$0]  %s648_s11, 128, %s650_s14, [#allocation4]  }
 0x1c4   :  { %854 = dma.done.wait [#allocation4], 128  }
 0x1c5   :  { %855 = vsyncadd [#allocation4], 4294967168 }
 0x1c6   :  { %657 = vsyncpa [#allocation3], 1 }
 0x1c7   :  { %658 = vsyncpa [#allocation6], 1 }
 0x1c8   :  { %659 = vsyncpa [#allocation9], 1 }
 0x1c9   :  { %660 = vsyncpa [#allocation12], 1 }
 0x1ca   :  { %661 = vsyncpa [#allocation4], 1 }

</bundles_post_ra>
